<compile_context>
chip_gen: v7x
topology: tpu7x:2x2x1
jax: 0.10.0
libtpu: 0.0.40
codegen_flags: <defaults>
</compile_context>

<pallas_src>
import functools

import jax
import jax.numpy as jnp
from jax import lax
from jax.experimental import pallas as pl
from jax.experimental.pallas import tpu as pltpu


def _round_up(x, m):
    return ((x + m - 1) // m) * m


def _cdiv(a, b):
    return (a + b - 1) // b


def _as_pair(v):
    if isinstance(v, (tuple, list)):
        return tuple(v)
    return (v, v)


def _im2col(x, kh, kw, stride, padding, dilation):
    """x: (B, C, H, W) -> patches (B*Ho*Wo, C*kh*kw), plus (Ho, Wo).

    Column ordering is c*(kh*kw) + ky*kw + kx, matching a PyTorch Conv2d
    weight flattened as weight.reshape(Cout, Cin*kh*kw).
    """
    B, C, H, W = x.shape
    sh, sw = stride
    ph, pw = padding
    dh, dw = dilation
    Ho = (H + 2 * ph - dh * (kh - 1) - 1) // sh + 1
    Wo = (W + 2 * pw - dw * (kw - 1) - 1) // sw + 1
    xp = jnp.pad(x, ((0, 0), (0, 0), (ph, ph), (pw, pw)))
    cols = []
    for ky in range(kh):
        for kx in range(kw):
            y0 = ky * dh
            x0 = kx * dw
            patch = xp[:, :, y0:y0 + (Ho - 1) * sh + 1:sh,
                             x0:x0 + (Wo - 1) * sw + 1:sw]   # (B, C, Ho, Wo)
            cols.append(patch)
    col = jnp.stack(cols, axis=2)                 # (B, C, kh*kw, Ho, Wo)
    col = col.transpose(0, 3, 4, 1, 2)            # (B, Ho, Wo, C, kh*kw)
    return col.reshape(B * Ho * Wo, C * kh * kw), Ho, Wo


def _matmul_bias_kernel(p_ref, w_ref, b_ref, o_ref, acc_ref):
    """One (tm, tn) output tile of  patches @ W_eff + bias.

    p_ref  : (tm, tk)  bf16 im2col patch tile
    w_ref  : (tk, tn)  bf16 merged conv+LoRA weight tile
    b_ref  : (1, tn)   f32 bias
    acc_ref: (tm, tn)  f32 accumulator (persists across the K grid axis)
    """
    k = pl.program_id(2)

    @pl.when(k == 0)
    def _():
        acc_ref[...] = jnp.zeros_like(acc_ref)

    acc_ref[...] += jnp.dot(p_ref[...], w_ref[...],
                            preferred_element_type=jnp.float32)

    @pl.when(k == pl.num_programs(2) - 1)
    def _():
        o_ref[...] = (acc_ref[...] + b_ref[...]).astype(o_ref.dtype)


def _pick_m_tiling(n, max_tile=512):
    """Row-tile size <= max_tile (multiple of 8) minimising padding."""
    n8 = _round_up(max(n, 8), 8)
    num = _cdiv(n8, max_tile)
    tm = _round_up(_cdiv(n8, num), 8)
    return tm, num


def _pick_n_tile(c_pad):
    """Lane tile: largest of {512, 384, 256, 128} dividing c_pad."""
    for cand in (512, 384, 256, 128):
        if c_pad % cand == 0:
            return cand
    return 128


def _pick_k_tiling(k_pad, max_single=2048, max_tile=512):
    """Single K block when the (merged, small) weight fits; else ~512 tiles."""
    if k_pad <= max_single:
        return k_pad, 1
    num = _cdiv(k_pad, max_tile)
    tk = _round_up(_cdiv(k_pad, num), 128)
    return tk, num


def lora_injected_conv2d(x, w_conv, b_conv, w_down, w_up, *,
                         stride=1, padding=0, dilation=1, groups=1,
                         scale=1.0, selector_diag=None,
                         compute_dtype=jnp.bfloat16):
    """Forward of LoraInjectedConv2d (inference: Dropout == identity)."""
    # TODO(synk): grouped convolution (groups > 1) not implemented.
    assert groups == 1, "only groups=1 is supported"
    # TODO(synk): train-mode Dropout (stochastic masking) not implemented;
    #             eval-mode forward (identity) is used, matching inference.
    stride = _as_pair(stride)
    padding = _as_pair(padding)
    dilation = _as_pair(dilation)

    B, Cin, H, W = x.shape
    Cout, _, kh, kw = w_conv.shape
    r = w_down.shape[0]
    out_dtype = x.dtype
    K = Cin * kh * kw

    # ---- Fold the LoRA branch into the conv weight (exact in eval mode):
    #   x*W + ((x*W_down)*W_up)*scale == x*(W + scale * W_up@W_down)
    # because lora_up is 1x1 and lora_down shares the conv geometry.
    wc = w_conv.reshape(Cout, K).astype(jnp.float32)        # (Cout, K)
    wd = w_down.reshape(r, K).astype(jnp.float32)           # (r, K)
    wu = w_up.reshape(Cout, r).astype(jnp.float32)          # (Cout, r)
    if selector_diag is not None:                            # optional selector
        wd = wd * selector_diag.astype(jnp.float32)[:, None]
    w_eff = wc + jnp.asarray(scale, jnp.float32) * (wu @ wd)  # (Cout, K), f32
    w_eff_t = w_eff.T.astype(compute_dtype)                   # (K, Cout), bf16

    bias = (b_conv if b_conv is not None else jnp.zeros((Cout,), jnp.float32))
    bias = bias.astype(jnp.float32).reshape(1, Cout)

    # ---- im2col emitted directly in the compute dtype (halves HBM traffic).
    patches, Ho, Wo = _im2col(x.astype(compute_dtype), kh, kw,
                              stride, padding, dilation)
    N = patches.shape[0]

    # ---- Tiling.
    C_pad = _round_up(Cout, 128)
    tn = _pick_n_tile(C_pad)
    tm, num_m = _pick_m_tiling(N)
    tk, num_k = _pick_k_tiling(_round_up(K, 128))
    # Ensure >= 2 parallel (i, j) blocks so both TensorCores get work (v7x).
    if num_m * (C_pad // tn) < 2 and tm > 8:
        num_m = 2
        tm = _round_up(_cdiv(_round_up(N, 8), 2), 8)
    N_pad = tm * num_m
    K_pad = tk * num_k

    patches = jnp.pad(patches, ((0, N_pad - N), (0, K_pad - K)))
    w_eff_t = jnp.pad(w_eff_t, ((0, K_pad - K), (0, C_pad - Cout)))
    bias = jnp.pad(bias, ((0, 0), (0, C_pad - Cout)))

    grid = (num_m, C_pad // tn, num_k)

    out = pl.pallas_call(
        _matmul_bias_kernel,
        out_shape=jax.ShapeDtypeStruct((N_pad, C_pad), out_dtype),
        grid_spec=pltpu.PrefetchScalarGridSpec(
            num_scalar_prefetch=0,
            grid=grid,
            in_specs=[
                pl.BlockSpec((tm, tk), lambda i, j, k: (i, k)),   # patches
                pl.BlockSpec((tk, tn), lambda i, j, k: (k, j)),   # W_eff
                pl.BlockSpec((1, tn), lambda i, j, k: (0, j)),    # bias
            ],
            out_specs=pl.BlockSpec((tm, tn), lambda i, j, k: (i, j)),
            scratch_shapes=[
                pltpu.VMEM((tm, tn), jnp.float32),   # f32 accumulator
            ],
        ),
        compiler_params=pltpu.CompilerParams(
            dimension_semantics=("parallel", "parallel", "arbitrary"),
            vmem_limit_bytes=32 * 1024 * 1024,
        ),
    )(patches, w_eff_t, bias)

    out = out[:N, :Cout].reshape(B, Ho, Wo, Cout)
    # NOTE: returning NCHW to match the PyTorch module; skipping this
    # transpose (NHWC consumers) would save one output-sized HBM pass.
    return out.transpose(0, 3, 1, 2)


if __name__ == "__main__":
    key = jax.random.PRNGKey(0)
    k_x, k_wc, k_b, k_wd, k_wu = jax.random.split(key, 5)

    # Small shapes consistent with the module: NCHW input, 3x3 conv, rank-4 LoRA.
    B, Cin, H, W = 2, 4, 16, 16
    Cout, kh, kw = 8, 3, 3
    stride, padding, dilation = 1, 1, 1
    r, scale = 4, 0.5

    x = jax.random.normal(k_x, (B, Cin, H, W), jnp.float32)
    w_conv = 0.1 * jax.random.normal(k_wc, (Cout, Cin, kh, kw), jnp.float32)
    b_conv = 0.1 * jax.random.normal(k_b, (Cout,), jnp.float32)
    # Module init: lora_down ~ N(0, 1/r), lora_up zero-initialized. Use small
    # non-zero lora_up here so the LoRA path is actually exercised.
    w_down = jax.random.normal(k_wd, (r, Cin, kh, kw), jnp.float32) / r
    w_up = 0.1 * jax.random.normal(k_wu, (Cout, r, 1, 1), jnp.float32)

    fwd = jax.jit(functools.partial(
        lora_injected_conv2d, stride=stride, padding=padding,
        dilation=dilation, scale=scale))
    out = jax.block_until_ready(fwd(x, w_conv, b_conv, w_down, w_up))

    # Pure-JAX f32 reference of the PyTorch forward (eval mode).
    dn = ("NCHW", "OIHW", "NCHW")

    def conv(a, w, s, p, d):
        return lax.conv_general_dilated(
            a, w, window_strides=(s, s), padding=((p, p), (p, p)),
            rhs_dilation=(d, d), dimension_numbers=dn,
            precision=lax.Precision.HIGHEST)

    ref_main = conv(x, w_conv, stride, padding, dilation) + b_conv.reshape(1, -1, 1, 1)
    ref_down = conv(x, w_down, stride, padding, dilation)
    ref_up = conv(ref_down, w_up, 1, 0, 1)
    ref = ref_main + ref_up * scale

    assert out.shape == ref.shape, (out.shape, ref.shape)
    max_err = float(jnp.max(jnp.abs(out - ref)))
    # bf16 operands (f32 accumulation) => relaxed tolerance vs the f32 ref.
    assert jnp.allclose(out, ref, atol=3e-2, rtol=3e-2), f"max_err={max_err}"

    print("KERNEL_OK")
</pallas_src>

<mosaic_0001>
module attributes {stable_mosaic.version = 11 : i64} {
  func.func @_matmul_bias_kernel(%arg0: i32, %arg1: i32, %arg2: i32, %arg3: memref<256x128xbf16, #tpu.memory_space<vmem>>, %arg4: memref<128x128xbf16, #tpu.memory_space<vmem>>, %arg5: memref<1x128xf32, #tpu.memory_space<vmem>>, %arg6: memref<256x128xf32, #tpu.memory_space<vmem>>, %arg7: memref<256x128xf32, #tpu.memory_space<vmem>>) attributes {dimension_semantics = [#tpu.dimension_semantics<parallel>, #tpu.dimension_semantics<parallel>, #tpu.dimension_semantics<arbitrary>], iteration_bounds = array<i64: 2, 1, 1>, scalar_prefetch = 0 : i64, scratch_operands = 1 : i64, tpu.core_type = #tpu.core_type<tc>, window_params = [{transform_indices = @transform_0, window_bounds = array<i64: 256, 128>}, {transform_indices = @transform_1, window_bounds = array<i64: 128, 128>}, {transform_indices = @transform_2, window_bounds = array<i64: 1, 128>}, {transform_indices = @transform_3, window_bounds = array<i64: 256, 128>}]} {
    %c0_i32 = arith.constant 0 : i32
    %0 = arith.cmpi eq, %arg2, %c0_i32 : i32
    %1 = arith.extui %0 : i1 to i32
    %c0_i32_0 = arith.constant 0 : i32
    %2 = arith.cmpi ne, %1, %c0_i32_0 : i32
    scf.if %2 {
      %cst_10 = arith.constant 0.000000e+00 : f32
      %12 = vector.broadcast %cst_10 : f32 to vector<256x128xf32>
      %c0_11 = arith.constant 0 : index
      %c0_12 = arith.constant 0 : index
      %13 = vector.load %arg7[%c0_11, %c0_12] : memref<256x128xf32, #tpu.memory_space<vmem>>, vector<256x128xf32>
      tpu.vector_store %arg7[%c0_11, %c0_12], %12 {strides = array<i32>} : memref<256x128xf32, #tpu.memory_space<vmem>>, vector<256x128xf32>,
    } else {
    }
    %c0 = arith.constant 0 : index
    %c0_1 = arith.constant 0 : index
    %3 = vector.load %arg7[%c0, %c0_1] : memref<256x128xf32, #tpu.memory_space<vmem>>, vector<256x128xf32>
    %c0_2 = arith.constant 0 : index
    %c0_3 = arith.constant 0 : index
    %4 = vector.load %arg3[%c0_2, %c0_3] : memref<256x128xbf16, #tpu.memory_space<vmem>>, vector<256x128xbf16>
    %c0_4 = arith.constant 0 : index
    %c0_5 = arith.constant 0 : index
    %5 = vector.load %arg4[%c0_4, %c0_5] : memref<128x128xbf16, #tpu.memory_space<vmem>>, vector<128x128xbf16>
    %cst = arith.constant dense<0.000000e+00> : vector<256x128xf32>
    %6 = tpu.matmul %4, %5, %cst {dimension_numbers = #tpu.dot_dimension_numbers<[1], [0], [0], [1], [0, 0, 1, 1], [], []>} : vector<256x128xbf16>, vector<128x128xbf16>, vector<256x128xf32> -> vector<256x128xf32>
    %7 = arith.addf %3, %6 : vector<256x128xf32>
    %c0_6 = arith.constant 0 : index
    %c0_7 = arith.constant 0 : index
    %8 = vector.load %arg7[%c0_6, %c0_7] : memref<256x128xf32, #tpu.memory_space<vmem>>, vector<256x128xf32>
    tpu.vector_store %arg7[%c0_6, %c0_7], %7 {strides = array<i32>} : memref<256x128xf32, #tpu.memory_space<vmem>>, vector<256x128xf32>,
    %c0_i32_8 = arith.constant 0 : i32
    %9 = arith.cmpi eq, %arg2, %c0_i32_8 : i32
    %10 = arith.extui %9 : i1 to i32
    %c0_i32_9 = arith.constant 0 : i32
    %11 = arith.cmpi ne, %10, %c0_i32_9 : i32
    scf.if %11 {
      %c0_10 = arith.constant 0 : index
      %c0_11 = arith.constant 0 : index
      %12 = vector.load %arg7[%c0_10, %c0_11] : memref<256x128xf32, #tpu.memory_space<vmem>>, vector<256x128xf32>
      %c0_12 = arith.constant 0 : index
      %c0_13 = arith.constant 0 : index
      %13 = vector.load %arg5[%c0_12, %c0_13] : memref<1x128xf32, #tpu.memory_space<vmem>>, vector<1x128xf32>
      %14 = vector.broadcast %13 : vector<1x128xf32> to vector<256x128xf32>
      %15 = arith.addf %12, %14 : vector<256x128xf32>
      %c0_14 = arith.constant 0 : index
      %c0_15 = arith.constant 0 : index
      %16 = vector.load %arg6[%c0_14, %c0_15] : memref<256x128xf32, #tpu.memory_space<vmem>>, vector<256x128xf32>
      tpu.vector_store %arg6[%c0_14, %c0_15], %15 {strides = array<i32>} : memref<256x128xf32, #tpu.memory_space<vmem>>, vector<256x128xf32>,
    } else {
    }
    return
  }
  func.func @transform_0(%arg0: i32, %arg1: i32, %arg2: i32) -> (i32, i32) {
    %c0_i32 = arith.constant 0 : i32
    return %arg0, %arg2 : i32, i32
  }
  func.func @transform_1(%arg0: i32, %arg1: i32, %arg2: i32) -> (i32, i32) {
    %c0_i32 = arith.constant 0 : i32
    return %arg2, %arg1 : i32, i32
  }
  func.func @transform_2(%arg0: i32, %arg1: i32, %arg2: i32) -> (i32, i32) {
    %c0_i32 = arith.constant 0 : i32
    %c0_i32_0 = arith.constant 0 : i32
    return %c0_i32, %arg1 : i32, i32
  }
  func.func @transform_3(%arg0: i32, %arg1: i32, %arg2: i32) -> (i32, i32) {
    %c0_i32 = arith.constant 0 : i32
    return %arg0, %arg1 : i32, i32
  }
}

</mosaic_0001>

<bundles_post_ra>
// kernel: lora_injected_conv2d.1
= control target key start
LH: loop header
LB: loop body
LE: loop exit
PB: predicated region body
PF: predicated region fallthrough
CT: control target
= control target key end

     0   :  { %s1180_s12 = smov 0   ;;  %s1182_s13 = smov 0   ;;  %s1330_s0 = inlined_call_operand.vmem [shape: bf16[512,128], index: 0, kind: input, shape index: {}]   ;;  %s1331_s1 = inlined_call_operand.vmem [shape: bf16[128,128], index: 1, kind: input, shape index: {}]   ;;  %s1332_s2 = inlined_call_operand.vmem [shape: f32[1,128], index: 2, kind: input, shape index: {}]   ;;  %s1333_s3 = inlined_call_operand.vmem [shape: f32[512,128], index: 3, kind: output, shape index: {}]  }
   0x1   :  { %s1184_s14 = smov 0  }
   0x2 LB: > { %s32_s15 = sadd.s32 1, %s1154_s13  ;;  %p968_p0 = scmp.ge.s32.totalorder %s1158_s14, 1  ;;  %s1158_s14 = sphi %s1184_s14, %s13_s14   ;;  %s1154_s13 = sphi %s1182_s13, %s1335_s13   ;;  %s1150_s12 = sphi %s1180_s12, %s1334_s12  }
   0x3   : > { %p34_p1 = scmp.ge.s32.totalorder %s32_s15, 2  ;;  %p188_p2 = scmp.lt.s32.totalorder %s1158_s14, 3 }
   0x5   : > { %s1337_s15 = smov (%p34_p1, %s32_s15), 0  ;;  %p189_p3 = pnand %p968_p0, %p188_p2 }
   0x6   : > { %v1112_v0 = vld [vmem:[%s1331_s1] sm:$0xff] (!%p189_p3)   ;;  %s969_s18 = sshll.u32 (!%p189_p3), %s1150_s12, 5  ;;  %v1113_v1 = vld [vmem:[%s1331_s1 + $0x8] sm:$0xff] (!%p189_p3)   ;;  %v1114_v2 = vld [vmem:[%s1331_s1 + $0x10] sm:$0xff] (!%p189_p3)  }
   0x7   : > { %192 = sbr.rel (%p189_p3) target bundleno = 281 (0x119), region = 32  ;;  %p230_p4 = scmp.lt.s32.totalorder (!%p189_p3), %s969_s18, 63  ;;  %1024 = vmatprep.subr.bf16.mxu0 (!%p189_p3), %v1112_v0  ;;  %1072 = vmatprep.subr.bf16.mxu1 (!%p189_p3), %v1112_v0  ;;  %v1115_v3 = vld [vmem:[%s1331_s1 + $0x18] sm:$0xff] (!%p189_p3)   ;;  %v1116_v6 = vld [vmem:[%s1331_s1 + $0x20] sm:$0xff] (!%p189_p3)   ;;  %v1117_v7 = vld [vmem:[%s1331_s1 + $0x28] sm:$0xff] (!%p189_p3)  }
   0x8   : > { %1025 = vmatpush3.bf16.msra.mxu0 (!%p189_p3), %v1112_v0  ;;  %1080 = vmatpush3.bf16.msra.mxu1 (!%p189_p3), %v1112_v0  ;;  %v1118_v8 = vld [vmem:[%s1331_s1 + $0x30] sm:$0xff] (!%p189_p3)   ;;  %v1119_v9 = vld [vmem:[%s1331_s1 + $0x38] sm:$0xff] (!%p189_p3)   ;;  %v1250_v24 = vld [vmem:[%s1332_s2] ss:$0 sm:$0xff] (!%p189_p3) }
   0x9   : > { %1026 = vmatprep.subr.bf16.mxu0 (!%p189_p3), %v1113_v1  ;;  %1073 = vmatprep.subr.bf16.mxu1 (!%p189_p3), %v1113_v1 }
   0xc   : > { %1027 = vmatpush3.bf16.msra.mxu0 (!%p189_p3), %v1113_v1  ;;  %1081 = vmatpush3.bf16.msra.mxu1 (!%p189_p3), %v1113_v1 }
   0xd   : > { %1028 = vmatprep.subr.bf16.mxu0 (!%p189_p3), %v1114_v2  ;;  %1074 = vmatprep.subr.bf16.mxu1 (!%p189_p3), %v1114_v2 }
   0xe   : > { %s1339_s18 = smov (!%p230_p4, %s969_s18), 63 }
   0xf   : > { %s970_s23 = sshll.u32 %s1339_s18, 2  ;;  %s972_s10 = sshll.u32 %s1339_s18, 3 }
  0x10   : > { %s1213_s26 = scalar_lea.vmem %s1330_s0, %s970_s23  ;;  %1029 = vmatpush3.bf16.msra.mxu0 %v1114_v2  ;;  %1082 = vmatpush3.bf16.msra.mxu1 %v1114_v2  ;;  %s1255_s19 = scalar_lea.vmem %s1333_s3, %s972_s10 }
  0x11   : > { %v1120_v4 = vld [vmem:[%s1213_s26] sm:$0xff]   ;;  %1030 = vmatprep.subr.bf16.mxu0 %v1115_v3  ;;  %1075 = vmatprep.subr.bf16.mxu1 %v1115_v3  ;;  %v1122_v10 = vld [vmem:[%s1213_s26 + $0x8] sm:$0xff]   ;;  %v1124_v12 = vld [vmem:[%s1213_s26 + $0x10] sm:$0xff]  }
  0x12   : > { %v1121_v5 = vld [vmem:[%s1213_s26 + $0x40] sm:$0xff]   ;;  %1040 = vmatprep.mubr.bf16.mxu0 %v1120_v4  ;;  %v1123_v11 = vld [vmem:[%s1213_s26 + $0x48] sm:$0xff]   ;;  %v1125_v13 = vld [vmem:[%s1213_s26 + $0x50] sm:$0xff]  }
  0x13   : > { %1056 = vmatprep.mubr.bf16.mxu1 %v1121_v5  ;;  %v1126_v14 = vld [vmem:[%s1213_s26 + $0x18] sm:$0xff]   ;;  %v1128_v16 = vld [vmem:[%s1213_s26 + $0x20] sm:$0xff]   ;;  %v1130_v18 = vld [vmem:[%s1213_s26 + $0x28] sm:$0xff]  }
  0x14   : > { %1031 = vmatpush3.bf16.msra.mxu0 %v1115_v3  ;;  %1083 = vmatpush3.bf16.msra.mxu1 %v1115_v3  ;;  %v1127_v15 = vld [vmem:[%s1213_s26 + $0x58] sm:$0xff]   ;;  %v1129_v17 = vld [vmem:[%s1213_s26 + $0x60] sm:$0xff]   ;;  %v1131_v19 = vld [vmem:[%s1213_s26 + $0x68] sm:$0xff]  }
  0x15   : > { %1032 = vmatprep.subr.bf16.mxu0 %v1116_v6  ;;  %1076 = vmatprep.subr.bf16.mxu1 %v1116_v6  ;;  %v1132_v20 = vld [vmem:[%s1213_s26 + $0x30] sm:$0xff]   ;;  %v1134_v22 = vld [vmem:[%s1213_s26 + $0x38] sm:$0xff]  }
  0x16   : > { %v1133_v21 = vld [vmem:[%s1213_s26 + $0x70] sm:$0xff]   ;;  %v1135_v23 = vld [vmem:[%s1213_s26 + $0x78] sm:$0xff]  }
  0x18   : > { %1033 = vmatpush3.bf16.msra.mxu0 %v1116_v6  ;;  %1084 = vmatpush3.bf16.msra.mxu1 %v1116_v6 }
  0x19   : > { %1034 = vmatprep.subr.bf16.mxu0 %v1117_v7  ;;  %1077 = vmatprep.subr.bf16.mxu1 %v1117_v7 }
  0x1c   : > { %1035 = vmatpush3.bf16.msra.mxu0 %v1117_v7  ;;  %1085 = vmatpush3.bf16.msra.mxu1 %v1117_v7 }
  0x1d   : > { %1036 = vmatprep.subr.bf16.mxu0 %v1118_v8  ;;  %1078 = vmatprep.subr.bf16.mxu1 %v1118_v8 }
  0x20   : > { %1037 = vmatpush3.bf16.msra.mxu0 %v1118_v8  ;;  %1086 = vmatpush3.bf16.msra.mxu1 %v1118_v8 }
  0x21   : > { %1038 = vmatprep.subr.bf16.mxu0 %v1119_v9  ;;  %1079 = vmatprep.subr.bf16.mxu1 %v1119_v9 }
  0x24   : > { %1039 = vmatpush3.bf16.msra.mxu0 %v1119_v9  ;;  %1087 = vmatpush3.bf16.msra.mxu1 %v1119_v9 }
  0x27   : > { %1041 = vmatmul.mubr.bf16.vlgmr.msra.gmra.mrb[0].mxu0 %v1122_v10  ;;  %1057 = vmatmul.mubr.bf16.vlgmr.msra.gmra.mrb[0].mxu1 %v1123_v11 }
  0x28   : > { %1044 = vmatprep.mubr.bf16.mxu0 %v1124_v12  ;;  %1060 = vmatprep.mubr.bf16.mxu1 %v1125_v13 }
  0x2f   : > { %1045 = vmatmul.mubr.bf16.gmra.mrb[4].mxu0 %v1126_v14  ;;  %1061 = vmatmul.mubr.bf16.gmra.mrb[4].mxu1 %v1127_v15 }
  0x30   : > { %1048 = vmatprep.mubr.bf16.mxu0 %v1128_v16  ;;  %1064 = vmatprep.mubr.bf16.mxu1 %v1129_v17 }
  0x37   : > { %1049 = vmatmul.mubr.bf16.gmra.mrb[8].mxu0 %v1130_v18  ;;  %1065 = vmatmul.mubr.bf16.gmra.mrb[8].mxu1 %v1131_v19 }
  0x38   : > { %1052 = vmatprep.mubr.bf16.mxu0 %v1132_v20  ;;  %1068 = vmatprep.mubr.bf16.mxu1 %v1133_v21 }
  0x3f   : > { %1053 = vmatmul.mubr.bf16.gmra.mrb[12].mxu0 %v1134_v22  ;;  %1069 = vmatmul.mubr.bf16.gmra.mrb[12].mxu1 %v1135_v23 }
  0xfa   : > { %v1042_v25 = vpop.f32.mrb[0].mxu0  ;;  %v1058_v26 = vpop.f32.mrb[0].mxu1 }
  0xfb   : > { %v789_v27 = vadd.f32 %v1042_v25, %v1250_v24  ;;  %v805_v28 = vadd.f32 %v1058_v26, %v1250_v24  ;;  %v554_v29 = vpop.f32.mrb[1].mxu0  ;;  %v618_v30 = vpop.f32.mrb[1].mxu1 }
  0xfc   : > { %v787_v31 = vadd.f32 %v1250_v24, %v554_v29  ;;  %v803_v32 = vadd.f32 %v1250_v24, %v618_v30  ;;  %v1043_v33 = vpop.f32.mrb[2].mxu0  ;;  %v1059_v34 = vpop.f32.mrb[2].mxu1 }
  0xfd   : > { %821 = vst [vmem:[%s1255_s19 + $0x10] sm:$0xff] %v789_v27  ;;  %837 = vst [vmem:[%s1255_s19 + $0x90] sm:$0xff] %v805_v28  ;;  %v790_v35 = vadd.f32 %v1043_v33, %v1250_v24  ;;  %v806_v36 = vadd.f32 %v1059_v34, %v1250_v24  ;;  %v557_v37 = vpop.f32.mrb[3].mxu0  ;;  %v621_v38 = vpop.f32.mrb[3].mxu1 }
  0xfe   : > { %819 = vst [vmem:[%s1255_s19] sm:$0xff] %v787_v31  ;;  %835 = vst [vmem:[%s1255_s19 + $0x80] sm:$0xff] %v803_v32  ;;  %v788_v39 = vadd.f32 %v1250_v24, %v557_v37  ;;  %v804_v40 = vadd.f32 %v1250_v24, %v621_v38 }
  0xff   : > { %822 = vst [vmem:[%s1255_s19 + $0x18] sm:$0xff] %v790_v35  ;;  %838 = vst [vmem:[%s1255_s19 + $0x98] sm:$0xff] %v806_v36 }
 0x100   : > { %820 = vst [vmem:[%s1255_s19 + $0x8] sm:$0xff] %v788_v39  ;;  %836 = vst [vmem:[%s1255_s19 + $0x88] sm:$0xff] %v804_v40 }
 0x102   : > { %v1046_v41 = vpop.f32.mrb[4].mxu0  ;;  %v1062_v42 = vpop.f32.mrb[4].mxu1 }
 0x103   : > { %v793_v43 = vadd.f32 %v1046_v41, %v1250_v24  ;;  %v809_v44 = vadd.f32 %v1062_v42, %v1250_v24  ;;  %v570_v45 = vpop.f32.mrb[5].mxu0  ;;  %v634_v46 = vpop.f32.mrb[5].mxu1 }
 0x104   : > { %v791_v47 = vadd.f32 %v1250_v24, %v570_v45  ;;  %v807_v48 = vadd.f32 %v1250_v24, %v634_v46  ;;  %v1047_v49 = vpop.f32.mrb[6].mxu0  ;;  %v1063_v50 = vpop.f32.mrb[6].mxu1 }
 0x105   : > { %825 = vst [vmem:[%s1255_s19 + $0x30] sm:$0xff] %v793_v43  ;;  %841 = vst [vmem:[%s1255_s19 + $0xb0] sm:$0xff] %v809_v44  ;;  %v794_v51 = vadd.f32 %v1047_v49, %v1250_v24  ;;  %v810_v52 = vadd.f32 %v1063_v50, %v1250_v24  ;;  %v573_v53 = vpop.f32.mrb[7].mxu0  ;;  %v637_v54 = vpop.f32.mrb[7].mxu1 }
 0x106   : > { %823 = vst [vmem:[%s1255_s19 + $0x20] sm:$0xff] %v791_v47  ;;  %839 = vst [vmem:[%s1255_s19 + $0xa0] sm:$0xff] %v807_v48  ;;  %v792_v55 = vadd.f32 %v1250_v24, %v573_v53  ;;  %v808_v56 = vadd.f32 %v1250_v24, %v637_v54 }
 0x107   : > { %826 = vst [vmem:[%s1255_s19 + $0x38] sm:$0xff] %v794_v51  ;;  %842 = vst [vmem:[%s1255_s19 + $0xb8] sm:$0xff] %v810_v52 }
 0x108   : > { %824 = vst [vmem:[%s1255_s19 + $0x28] sm:$0xff] %v792_v55  ;;  %840 = vst [vmem:[%s1255_s19 + $0xa8] sm:$0xff] %v808_v56 }
 0x10a   : > { %v1050_v57 = vpop.f32.mrb[8].mxu0  ;;  %v1066_v58 = vpop.f32.mrb[8].mxu1 }
 0x10b   : > { %v797_v59 = vadd.f32 %v1050_v57, %v1250_v24  ;;  %v813_v60 = vadd.f32 %v1066_v58, %v1250_v24  ;;  %v586_v61 = vpop.f32.mrb[9].mxu0  ;;  %v650_v62 = vpop.f32.mrb[9].mxu1 }
 0x10c   : > { %v795_v63 = vadd.f32 %v1250_v24, %v586_v61  ;;  %v811_v0 = vadd.f32 %v1250_v24, %v650_v62  ;;  %v1051_v1 = vpop.f32.mrb[10].mxu0  ;;  %v1067_v2 = vpop.f32.mrb[10].mxu1 }
 0x10d   : > { %829 = vst [vmem:[%s1255_s19 + $0x50] sm:$0xff] %v797_v59  ;;  %845 = vst [vmem:[%s1255_s19 + $0xd0] sm:$0xff] %v813_v60  ;;  %v798_v3 = vadd.f32 %v1051_v1, %v1250_v24  ;;  %v814_v4 = vadd.f32 %v1067_v2, %v1250_v24  ;;  %v589_v5 = vpop.f32.mrb[11].mxu0  ;;  %v653_v6 = vpop.f32.mrb[11].mxu1 }
 0x10e   : > { %827 = vst [vmem:[%s1255_s19 + $0x40] sm:$0xff] %v795_v63  ;;  %843 = vst [vmem:[%s1255_s19 + $0xc0] sm:$0xff] %v811_v0  ;;  %v796_v7 = vadd.f32 %v1250_v24, %v589_v5  ;;  %v812_v8 = vadd.f32 %v1250_v24, %v653_v6 }
 0x10f   : > { %830 = vst [vmem:[%s1255_s19 + $0x58] sm:$0xff] %v798_v3  ;;  %846 = vst [vmem:[%s1255_s19 + $0xd8] sm:$0xff] %v814_v4 }
 0x110   : > { %828 = vst [vmem:[%s1255_s19 + $0x48] sm:$0xff] %v796_v7  ;;  %844 = vst [vmem:[%s1255_s19 + $0xc8] sm:$0xff] %v812_v8 }
 0x112   : > { %v1054_v9 = vpop.f32.mrb[12].mxu0  ;;  %v1070_v10 = vpop.f32.mrb[12].mxu1 }
 0x113   : > { %v801_v11 = vadd.f32 %v1054_v9, %v1250_v24  ;;  %v817_v12 = vadd.f32 %v1070_v10, %v1250_v24  ;;  %v602_v13 = vpop.f32.mrb[13].mxu0  ;;  %v666_v14 = vpop.f32.mrb[13].mxu1 }
 0x114   : > { %v799_v15 = vadd.f32 %v1250_v24, %v602_v13  ;;  %v815_v16 = vadd.f32 %v1250_v24, %v666_v14  ;;  %v1055_v17 = vpop.f32.mrb[14].mxu0  ;;  %v1071_v18 = vpop.f32.mrb[14].mxu1 }
 0x115   : > { %833 = vst [vmem:[%s1255_s19 + $0x70] sm:$0xff] %v801_v11  ;;  %849 = vst [vmem:[%s1255_s19 + $0xf0] sm:$0xff] %v817_v12  ;;  %v802_v19 = vadd.f32 %v1055_v17, %v1250_v24  ;;  %v818_v20 = vadd.f32 %v1071_v18, %v1250_v24  ;;  %v605_v21 = vpop.f32.mrb[15].mxu0  ;;  %v669_v22 = vpop.f32.mrb[15].mxu1 }
 0x116   : > { %831 = vst [vmem:[%s1255_s19 + $0x60] sm:$0xff] %v799_v15  ;;  %847 = vst [vmem:[%s1255_s19 + $0xe0] sm:$0xff] %v815_v16  ;;  %v800_v23 = vadd.f32 %v1250_v24, %v605_v21  ;;  %v816_v25 = vadd.f32 %v1250_v24, %v669_v22 }
 0x117   : > { %834 = vst [vmem:[%s1255_s19 + $0x78] sm:$0xff] %v802_v19  ;;  %850 = vst [vmem:[%s1255_s19 + $0xf8] sm:$0xff] %v818_v20 }
 0x118   : > { %832 = vst [vmem:[%s1255_s19 + $0x68] sm:$0xff] %v800_v23  ;;  %848 = vst [vmem:[%s1255_s19 + $0xe8] sm:$0xff] %v816_v25 }
 0x119 PF: > { %s13_s14 = sadd.s32 1, %s1158_s14   ;;  %s1334_s12 = smov %s1154_s13 }
 0x11a   : > { %p10_p5 = scmp.ge.s32.totalorder %s13_s14, 4   ;;  %s1335_s13 = smov %s1337_s15 }
 0x11c   :  { %12 = sbr.rel (!%p10_p5) target bundleno = 2 (0x2), region = 76 }

</bundles_post_ra>
